<compile_context>
chip_gen: v5e
topology: v5e:2x2
jax: 0.10.0
libtpu: 0.0.40
codegen_flags: <defaults>
</compile_context>

<pallas_src>
import jax
import jax.numpy as jnp
from jax import lax
from jax.experimental import pallas as pl
from jax.experimental.pallas import tpu as pltpu


def make_moe_kernel(num_experts: int, rank: int, scaling: float):
    er = num_experts * rank

    def moe_kernel(x_ref, wg_ref, a_ref, b_ref, o_ref):
        x = x_ref[...]                                                 # (tm, D)
        tm = x.shape[0]

        # ---- gating: argmax + selected softmax prob, no full softmax ----
        logits = jnp.dot(x, wg_ref[...],
                         preferred_element_type=jnp.float32)          # (tm, E)
        m = jnp.max(logits, axis=-1, keepdims=True)                   # (tm, 1)
        denom = jnp.sum(jnp.exp(logits - m), axis=-1, keepdims=True)  # (tm, 1)
        # prob of the argmax expert = exp(0)/denom = 1/denom; fold `scaling`.
        # (approx=True would push this to the EUP for free, but exact keeps a
        #  tight tolerance vs the f32 reference.)
        w_sel = pl.reciprocal(denom, approx=False) * scaling          # (tm, 1)
        eidx = lax.broadcasted_iota(jnp.int32, logits.shape, 1)
        gate = jnp.min(jnp.where(logits == m, eidx, num_experts),
                       axis=-1, keepdims=True)                        # (tm, 1) argmax

        # ---- routing weight over the stacked rank lanes (pure VPU, no relayout)
        lane = lax.broadcasted_iota(jnp.int32, (tm, er), 1)           # (tm, E*r)
        lo = gate * rank                                              # (tm, 1)
        w_full = jnp.where((lane >= lo) & (lane < lo + rank), w_sel, 0.0)

        # ---- experts: two matmuls for the whole MoE ----
        a_flat = a_ref[...]                                           # (D, E*r)
        b_flat = b_ref[...]                                           # (E*r, D)
        h = jnp.dot(x, a_flat, preferred_element_type=jnp.float32)    # (tm, E*r)
        hw = (h * w_full).astype(b_flat.dtype)
        out = jnp.dot(hw, b_flat, preferred_element_type=jnp.float32)  # (tm, D)
        o_ref[...] = out.astype(o_ref.dtype)

    return moe_kernel


def moe_adaptors_linear(x, wg_t, a_t, b_t, *, scaling, tm=256):
    """x: (bsz, seq, D) or (N, D); wg_t: (D, E); a_t: (E, D, r); b_t: (E, r, D).

    For best MXU/HBM efficiency pass bf16 x / weights (v6e, v7x); accumulation
    and gating stay f32 inside the kernel.
    """
    orig_shape = x.shape
    D = orig_shape[-1]
    x2 = x.reshape(-1, D)
    N = x2.shape[0]
    E = wg_t.shape[1]
    r = a_t.shape[-1]

    # Stack the experts along the contraction axis (one-time, outside the kernel).
    a_flat = jnp.transpose(a_t, (1, 0, 2)).reshape(D, E * r)   # (D, E*r)
    b_flat = b_t.reshape(E * r, D)                             # (E*r, D)

    # Token tile: large (MXU / HBM efficiency), multiple of 8, but do not
    # over-pad tiny inputs. Pad N up to a multiple of tm; padded rows are
    # computed (harmless) and sliced off.
    tm = max(8, min(int(tm), ((N + 7) // 8) * 8))
    n_pad = (-N) % tm
    if n_pad:
        x2 = jnp.pad(x2, ((0, n_pad), (0, 0)))
    n_padded = x2.shape[0]

    kernel = make_moe_kernel(E, r, float(scaling))
    out = pl.pallas_call(
        kernel,
        out_shape=jax.ShapeDtypeStruct((n_padded, D), x2.dtype),
        grid_spec=pltpu.PrefetchScalarGridSpec(
            num_scalar_prefetch=0,
            grid=(n_padded // tm,),
            in_specs=[
                pl.BlockSpec((tm, D), lambda i: (i, 0)),          # x token tile
                pl.BlockSpec((D, E), lambda i: (0, 0)),           # gate weight^T (resident)
                pl.BlockSpec((D, E * r), lambda i: (0, 0)),       # stacked adapter_A^T (resident)
                pl.BlockSpec((E * r, D), lambda i: (0, 0)),       # stacked adapter_B^T (resident)
            ],
            out_specs=pl.BlockSpec((tm, D), lambda i: (i, 0)),
        ),
        compiler_params=pltpu.CompilerParams(
            dimension_semantics=("parallel",),
            vmem_limit_bytes=64 * 1024 * 1024,
        ),
    )(x2, wg_t, a_flat, b_flat)

    if n_pad:
        out = out[:N]
    return out.reshape(orig_shape)


def moe_reference(x, wg_t, a_t, b_t, *, scaling):
    """Pure-JAX reference mirroring the PyTorch forward."""
    orig_shape = x.shape
    x2 = x.reshape(-1, orig_shape[-1])
    E = wg_t.shape[1]
    prob = jax.nn.softmax(x2 @ wg_t, axis=-1)
    gate = jnp.argmax(prob, axis=-1)
    p_sel = jnp.take_along_axis(prob, gate[:, None], axis=1)
    h = jnp.einsum('nd,edr->ner', x2, a_t)
    y = jnp.einsum('ner,erd->ned', h, b_t)
    onehot = jax.nn.one_hot(gate, E, dtype=x2.dtype)
    out = jnp.einsum('ned,ne->nd', y, onehot) * scaling * p_sel
    return out.reshape(orig_shape)


if __name__ == "__main__":
    # Small config consistent with the module: in_features == out_features.
    bsz, seq = 2, 8
    D = 128           # in_features == out_features (gate requires equality); lane-dense
    r = 16
    alpha_r = 32
    E = 4             # num_expert
    scaling = r / alpha_r

    key = jax.random.PRNGKey(0)
    kx, kg, ka, kb = jax.random.split(key, 4)
    x = jax.random.normal(kx, (bsz, seq, D), dtype=jnp.float32)
    # Deterministic synthetic parameters (stand-in for kaiming_uniform_ init).
    wg_t = 0.1 * jax.random.normal(kg, (D, E), dtype=jnp.float32)       # gate.weight^T
    a_t = 0.1 * jax.random.normal(ka, (E, D, r), dtype=jnp.float32)     # adapter_A.weight^T, stacked
    b_t = 0.1 * jax.random.normal(kb, (E, r, D), dtype=jnp.float32)     # adapter_B.weight^T, stacked

    out = moe_adaptors_linear(x, wg_t, a_t, b_t, scaling=scaling, tm=256)
    out = jax.block_until_ready(out)

    ref = moe_reference(x, wg_t, a_t, b_t, scaling=scaling)
    assert out.shape == (bsz, seq, D)
    assert jnp.allclose(out, ref, atol=1e-5, rtol=1e-5), "mismatch vs reference"
    print("KERNEL_OK")
</pallas_src>

<mosaic_0001>
module attributes {stable_mosaic.version = 11 : i64} {
  func.func @moe_kernel(%arg0: i32, %arg1: memref<16x128xf32, #tpu.memory_space<vmem>>, %arg2: memref<128x4xf32, #tpu.memory_space<vmem>>, %arg3: memref<128x64xf32, #tpu.memory_space<vmem>>, %arg4: memref<64x128xf32, #tpu.memory_space<vmem>>, %arg5: memref<16x128xf32, #tpu.memory_space<vmem>>) attributes {dimension_semantics = [#tpu.dimension_semantics<parallel>], iteration_bounds = array<i64: 1>, scalar_prefetch = 0 : i64, scratch_operands = 0 : i64, tpu.core_type = #tpu.core_type<tc>, window_params = [{transform_indices = @transform_0, window_bounds = array<i64: 16, 128>}, {pipeline_mode = #tpu.pipeline_mode<synchronous>, transform_indices = @transform_1, window_bounds = array<i64: 128, 4>}, {pipeline_mode = #tpu.pipeline_mode<synchronous>, transform_indices = @transform_2, window_bounds = array<i64: 128, 64>}, {pipeline_mode = #tpu.pipeline_mode<synchronous>, transform_indices = @transform_3, window_bounds = array<i64: 64, 128>}, {transform_indices = @transform_4, window_bounds = array<i64: 16, 128>}]} {
    %c0 = arith.constant 0 : index
    %c0_0 = arith.constant 0 : index
    %0 = vector.load %arg1[%c0, %c0_0] : memref<16x128xf32, #tpu.memory_space<vmem>>, vector<16x128xf32>
    %c0_1 = arith.constant 0 : index
    %c0_2 = arith.constant 0 : index
    %1 = vector.load %arg2[%c0_1, %c0_2] : memref<128x4xf32, #tpu.memory_space<vmem>>, vector<128x4xf32>
    %cst = arith.constant dense<0.000000e+00> : vector<16x4xf32>
    %2 = tpu.matmul %0, %1, %cst {dimension_numbers = #tpu.dot_dimension_numbers<[1], [0], [0], [1], [0, 0, 1, 1], [], []>} : vector<16x128xf32>, vector<128x4xf32>, vector<16x4xf32> -> vector<16x4xf32>
    %cst_3 = arith.constant dense<0xFF800000> : vector<16xf32>
    %3 = vector.multi_reduction <maximumf>, %2, %cst_3 [1] : vector<16x4xf32> to vector<16xf32>
    %4 = vector.shape_cast %3 : vector<16xf32> to vector<16x1xf32>
    %5 = vector.broadcast %4 : vector<16x1xf32> to vector<16x4xf32>
    %6 = arith.subf %2, %5 : vector<16x4xf32>
    %7 = math.exp %6 : vector<16x4xf32>
    %cst_4 = arith.constant dense<0.000000e+00> : vector<16xf32>
    %8 = vector.multi_reduction <add>, %7, %cst_4 [1] : vector<16x4xf32> to vector<16xf32>
    %9 = vector.shape_cast %8 : vector<16xf32> to vector<16x1xf32>
    %10 = tpu.reciprocal %9 : vector<16x1xf32> -> vector<16x1xf32>
    %cst_5 = arith.constant 5.000000e-01 : f32
    %11 = vector.broadcast %cst_5 : f32 to vector<16x1xf32>
    %12 = arith.mulf %10, %11 : vector<16x1xf32>
    %13 = tpu.iota {dimensions = array<i32: 1>} : vector<16x4xi32>
    %14 = vector.broadcast %4 : vector<16x1xf32> to vector<16x4xf32>
    %15 = arith.cmpf oeq, %2, %14 : vector<16x4xf32>
    %c4_i32 = arith.constant 4 : i32
    %16 = vector.broadcast %c4_i32 : i32 to vector<16x4xi32>
    %17 = arith.select %15, %13, %16 : vector<16x4xi1>, vector<16x4xi32>
    %cst_6 = arith.constant dense<2147483647> : vector<16xi32>
    %18 = vector.multi_reduction <minsi>, %17, %cst_6 [1] : vector<16x4xi32> to vector<16xi32>
    %19 = vector.shape_cast %18 : vector<16xi32> to vector<16x1xi32>
    %20 = tpu.iota {dimensions = array<i32: 1>} : vector<16x64xi32>
    %c16_i32 = arith.constant 16 : i32
    %21 = vector.broadcast %c16_i32 : i32 to vector<16x1xi32>
    %22 = arith.muli %19, %21 : vector<16x1xi32>
    %23 = vector.broadcast %22 : vector<16x1xi32> to vector<16x64xi32>
    %24 = arith.cmpi sge, %20, %23 : vector<16x64xi32>
    %c16_i32_7 = arith.constant 16 : i32
    %25 = vector.broadcast %c16_i32_7 : i32 to vector<16x1xi32>
    %26 = arith.addi %22, %25 : vector<16x1xi32>
    %27 = vector.broadcast %26 : vector<16x1xi32> to vector<16x64xi32>
    %28 = arith.cmpi slt, %20, %27 : vector<16x64xi32>
    %29 = arith.andi %24, %28 : vector<16x64xi1>
    %cst_8 = arith.constant 0.000000e+00 : f32
    %30 = vector.shape_cast %12 : vector<16x1xf32> to vector<16x1xf32>
    %31 = vector.broadcast %30 : vector<16x1xf32> to vector<16x64xf32>
    %32 = vector.broadcast %cst_8 : f32 to vector<16x64xf32>
    %33 = arith.select %29, %31, %32 : vector<16x64xi1>, vector<16x64xf32>
    %c0_9 = arith.constant 0 : index
    %c0_10 = arith.constant 0 : index
    %34 = vector.load %arg3[%c0_9, %c0_10] : memref<128x64xf32, #tpu.memory_space<vmem>>, vector<128x64xf32>
    %c0_11 = arith.constant 0 : index
    %c0_12 = arith.constant 0 : index
    %35 = vector.load %arg4[%c0_11, %c0_12] : memref<64x128xf32, #tpu.memory_space<vmem>>, vector<64x128xf32>
    %cst_13 = arith.constant dense<0.000000e+00> : vector<16x64xf32>
    %36 = tpu.matmul %0, %34, %cst_13 {dimension_numbers = #tpu.dot_dimension_numbers<[1], [0], [0], [1], [0, 0, 1, 1], [], []>} : vector<16x128xf32>, vector<128x64xf32>, vector<16x64xf32> -> vector<16x64xf32>
    %37 = arith.mulf %36, %33 : vector<16x64xf32>
    %cst_14 = arith.constant dense<0.000000e+00> : vector<16x128xf32>
    %38 = tpu.matmul %37, %35, %cst_14 {dimension_numbers = #tpu.dot_dimension_numbers<[1], [0], [0], [1], [0, 0, 1, 1], [], []>} : vector<16x64xf32>, vector<64x128xf32>, vector<16x128xf32> -> vector<16x128xf32>
    %c0_15 = arith.constant 0 : index
    %c0_16 = arith.constant 0 : index
    %39 = vector.load %arg5[%c0_15, %c0_16] : memref<16x128xf32, #tpu.memory_space<vmem>>, vector<16x128xf32>
    tpu.vector_store %arg5[%c0_15, %c0_16], %38 {strides = array<i32>} : memref<16x128xf32, #tpu.memory_space<vmem>>, vector<16x128xf32>,
    return
  }
  func.func @transform_0(%arg0: i32) -> (i32, i32) {
    %c0_i32 = arith.constant 0 : i32
    %c0_i32_0 = arith.constant 0 : i32
    return %arg0, %c0_i32 : i32, i32
  }
  func.func @transform_1(%arg0: i32) -> (i32, i32) {
    %c0_i32 = arith.constant 0 : i32
    %c0_i32_0 = arith.constant 0 : i32
    %c0_i32_1 = arith.constant 0 : i32
    return %c0_i32, %c0_i32_0 : i32, i32
  }
  func.func @transform_2(%arg0: i32) -> (i32, i32) {
    %c0_i32 = arith.constant 0 : i32
    %c0_i32_0 = arith.constant 0 : i32
    %c0_i32_1 = arith.constant 0 : i32
    return %c0_i32, %c0_i32_0 : i32, i32
  }
  func.func @transform_3(%arg0: i32) -> (i32, i32) {
    %c0_i32 = arith.constant 0 : i32
    %c0_i32_0 = arith.constant 0 : i32
    %c0_i32_1 = arith.constant 0 : i32
    return %c0_i32, %c0_i32_0 : i32, i32
  }
  func.func @transform_4(%arg0: i32) -> (i32, i32) {
    %c0_i32 = arith.constant 0 : i32
    %c0_i32_0 = arith.constant 0 : i32
    return %arg0, %c0_i32 : i32, i32
  }
}

</mosaic_0001>

<bundles_post_ra>
// kernel: tpu_custom_call.1
= control target key start
LH: loop header
LB: loop body
LE: loop exit
PB: predicated region body
PF: predicated region fallthrough
CT: control target
= control target key end

     0   :  { %s497_s0 = inlined_call_operand.vmem [shape: f32[16,128], index: 0, kind: input, shape index: {}]   ;;  %s498_s1 = inlined_call_operand.vmem [shape: f32[128,4], index: 1, kind: input, shape index: {}]   ;;  %s499_s2 = inlined_call_operand.vmem [shape: f32[128,64], index: 2, kind: input, shape index: {}]   ;;  %s500_s3 = inlined_call_operand.vmem [shape: f32[64,128], index: 3, kind: input, shape index: {}]   ;;  %s501_s4 = inlined_call_operand.hbm [shape: f32[16,128], index: 4, kind: output, shape index: {}]  }
   0x1   :  { %v35_v0 = vld [vmem:[%s498_s1 + $0x78] sm:$0xff]  ;;  %v34_v1 = vld [vmem:[%s498_s1 + $0x70] sm:$0xff]  ;;  %v33_v2 = vld [vmem:[%s498_s1 + $0x68] sm:$0xff] }
   0x2   :  { %36 = vmatpush.msra.mxu0 %v35_v0  ;;  %257 = vmatpush.msra.mxu3 %v35_v0  ;;  %v32_v3 = vld [vmem:[%s498_s1 + $0x60] sm:$0xff]  ;;  %v31_v4 = vld [vmem:[%s498_s1 + $0x58] sm:$0xff] }
   0x4   :  { %37 = vmatpush.msra.mxu0 %v34_v1  ;;  %258 = vmatpush.msra.mxu3 %v34_v1 }
   0x6   :  { %38 = vmatpush.msra.mxu0 %v33_v2  ;;  %259 = vmatpush.msra.mxu3 %v33_v2 }
   0x7   :  { %9 = vsyncpa [#allocation3], 0  ;;  %v30_v5 = vld [vmem:[%s498_s1 + $0x50] sm:$0xff]  ;;  %v29_v6 = vld [vmem:[%s498_s1 + $0x48] sm:$0xff]  ;;  %vm59_vm0 = vcmask 31744   ;;  %v108_v26 = vlaneseq  ;;  %vm205_vm15 = vcmask 523264  }
   0x8   :  { %39 = vmatpush.msra.mxu0 %v32_v3  ;;  %260 = vmatpush.msra.mxu3 %v32_v3  ;;  %v28_v7 = vld [vmem:[%s498_s1 + $0x40] sm:$0xff]  ;;  %v27_v8 = vld [vmem:[%s498_s1 + $0x38] sm:$0xff]  ;;  %v26_v9 = vld [vmem:[%s498_s1 + $0x30] sm:$0xff]  ;;  %s243_s19 = sshll.u32 %s501_s4, 4  ;;  %s311_s20 = smov 128   ;;  %s244_s19 = int_to_ptr.hbm [resolvable:$true] %s243_s19 }
   0x9   :  { %v25_v10 = vld [vmem:[%s498_s1 + $0x28] sm:$0xff]  ;;  %v24_v11 = vld [vmem:[%s498_s1 + $0x20] sm:$0xff]  ;;  %v23_v12 = vld [vmem:[%s498_s1 + $0x18] sm:$0xff]  ;;  %v418_v29 = vand.u32 127, %v108_v26  ;;  %s312_s21 = smov 8  }
   0xa   :  { %40 = vmatpush.msra.mxu0 %v31_v4  ;;  %261 = vmatpush.msra.mxu3 %v31_v4  ;;  %v22_v13 = vld [vmem:[%s498_s1 + $0x10] sm:$0xff]  ;;  %v21_v14 = vld [vmem:[%s498_s1 + $0x8] sm:$0xff]  ;;  %v20_v15 = vld [vmem:[%s498_s1] sm:$0xff] }
   0xb   :  { %v389_v16 = vld [vmem:[%s497_s0] sm:$0xff]  ;;  %v394_v17 = vld [vmem:[%s497_s0 + $0x8] sm:$0xff]  ;;  %v171_v22 = vld [vmem:[%s499_s2 + $0x78] sm:$0xff] }
   0xc   :  { %41 = vmatpush.msra.mxu0 %v30_v5  ;;  %262 = vmatpush.msra.mxu3 %v30_v5  ;;  %v170_v23 = vld [vmem:[%s499_s2 + $0x70] sm:$0xff]  ;;  %v169_v24 = vld [vmem:[%s499_s2 + $0x68] sm:$0xff]  ;;  %v168_v25 = vld [vmem:[%s499_s2 + $0x60] sm:$0xff] }
   0xd   :  { %180 = vmatpush.msra.mxu1 %v171_v22  ;;  %v167_v27 = vld [vmem:[%s499_s2 + $0x58] sm:$0xff]  ;;  %v166_v28 = vld [vmem:[%s499_s2 + $0x50] sm:$0xff]  ;;  %v165_v30 = vld [vmem:[%s499_s2 + $0x48] sm:$0xff] }
   0xe   :  { %42 = vmatpush.msra.mxu0 %v29_v6  ;;  %263 = vmatpush.msra.mxu3 %v29_v6  ;;  %v164_v33 = vld [vmem:[%s499_s2 + $0x40] sm:$0xff]  ;;  %v163_v37 = vld [vmem:[%s499_s2 + $0x38] sm:$0xff]  ;;  %v162_v39 = vld [vmem:[%s499_s2 + $0x30] sm:$0xff] }
   0xf   :  { %181 = vmatpush.msra.mxu1 %v170_v23  ;;  %v161_v41 = vld [vmem:[%s499_s2 + $0x28] sm:$0xff]  ;;  %v160_v44 = vld [vmem:[%s499_s2 + $0x20] sm:$0xff]  ;;  %v159_v49 = vld [vmem:[%s499_s2 + $0x18] sm:$0xff] }
  0x10   :  { %43 = vmatpush.msra.mxu0 %v28_v7  ;;  %264 = vmatpush.msra.mxu3 %v28_v7  ;;  %v158_v52 = vld [vmem:[%s499_s2 + $0x10] sm:$0xff]  ;;  %v157_v56 = vld [vmem:[%s499_s2 + $0x8] sm:$0xff]  ;;  %v156_v57 = vld [vmem:[%s499_s2] sm:$0xff] }
  0x11   :  { %182 = vmatpush.msra.mxu1 %v169_v24  ;;  %v179_v58 = vld [vmem:[%s500_s3 + $0x38] sm:$0xff]  ;;  %v178_v3 = vld [vmem:[%s500_s3 + $0x30] sm:$0xff]  ;;  %v177_v4 = vld [vmem:[%s500_s3 + $0x28] sm:$0xff] }
  0x12   :  { %44 = vmatpush.msra.mxu0 %v27_v8  ;;  %265 = vmatpush.msra.mxu3 %v27_v8  ;;  %v176_v5 = vld [vmem:[%s500_s3 + $0x20] sm:$0xff]  ;;  %v175_v7 = vld [vmem:[%s500_s3 + $0x18] sm:$0xff]  ;;  %v174_v8 = vld [vmem:[%s500_s3 + $0x10] sm:$0xff] }
  0x13   :  { %183 = vmatpush.msra.mxu1 %v168_v25  ;;  %220 = vmatpush.msra.mxu2 %v179_v58 }
  0x14   :  { %45 = vmatpush.msra.mxu0 %v26_v9  ;;  %266 = vmatpush.msra.mxu3 %v26_v9  ;;  %v173_v9 = vld [vmem:[%s500_s3 + $0x8] sm:$0xff] }
  0x15   :  { %184 = vmatpush.msra.mxu1 %v167_v27  ;;  %221 = vmatpush.msra.mxu2 %v178_v3 }
  0x16   :  { %46 = vmatpush.msra.mxu0 %v25_v10  ;;  %267 = vmatpush.msra.mxu3 %v25_v10  ;;  %v172_v10 = vld [vmem:[%s500_s3] sm:$0xff]  ;;  %s310_s3 = smov [#allocation2]  }
  0x17   :  { %185 = vmatpush.msra.mxu1 %v166_v28  ;;  %222 = vmatpush.msra.mxu2 %v177_v4  ;;  %s241_s16 = sshll.u32 %s310_s3, 4  ;;  %s242_s16 = int_to_ptr.vmem [resolvable:$true] %s241_s16 }
  0x18   :  { %47 = vmatpush.msra.mxu0 %v24_v11  ;;  %268 = vmatpush.msra.mxu3 %v24_v11 }
  0x19   :  { %186 = vmatpush.msra.mxu1 %v165_v30  ;;  %223 = vmatpush.msra.mxu2 %v176_v5 }
  0x1a   :  { %48 = vmatpush.msra.mxu0 %v23_v12  ;;  %269 = vmatpush.msra.mxu3 %v23_v12 }
  0x1b   :  { %187 = vmatpush.msra.mxu1 %v164_v33  ;;  %224 = vmatpush.msra.mxu2 %v175_v7 }
  0x1c   :  { %49 = vmatpush.msra.mxu0 %v22_v13  ;;  %270 = vmatpush.msra.mxu3 %v22_v13 }
  0x1d   :  { %188 = vmatpush.msra.mxu1 %v163_v37  ;;  %225 = vmatpush.msra.mxu2 %v174_v8 }
  0x1e   :  { %50 = vmatpush.msra.mxu0 %v21_v14  ;;  %271 = vmatpush.msra.mxu3 %v21_v14 }
  0x1f   :  { %189 = vmatpush.msra.mxu1 %v162_v39  ;;  %226 = vmatpush.msra.mxu2 %v173_v9 }
  0x20   :  { %51 = vmatpush.msra.mxu0 %v20_v15  ;;  %272 = vmatpush.msra.mxu3 %v20_v15 }
  0x21   :  { %52 = vmatmul.f32.vlgmr.msra.gmra.mxu0 %v389_v16  ;;  %55 = vmatmul.f32.vlgmr.msra.gmra.mxu3 %v394_v17 }
  0x22   :  { %190 = vmatpush.msra.mxu1 %v161_v41  ;;  %227 = vmatpush.msra.mxu2 %v172_v10 }
  0x24   :  { %191 = vmatpush.msra.mxu1 %v160_v44 }
  0x26   :  { %192 = vmatpush.msra.mxu1 %v159_v49 }
  0x28   :  { %193 = vmatpush.msra.mxu1 %v158_v52 }
  0x2a   :  { %194 = vmatpush.msra.mxu1 %v157_v56 }
  0x2c   :  { %195 = vmatpush.msra.mxu1 %v156_v57 }
  0x2d   :  { %196 = vmatmul.f32.vlgmr.msra.gmra.mxu1 %v389_v16 }
  0x35   :  { %199 = vmatmul.f32.gmra.mxu1 %v394_v17 }
  0x9e   :  { %v53_v18 = vpop.f32.mrf.mxu0 }
  0x9f   :  { %v60_v19 = vsel %vm59_vm0, %v53_v18, -inf }
  0xa0   :  { %61 = vmax.xlane.f32.xlu0 %v60_v19 }
  0xa4   :  { %v56_v20 = vpop.f32.mrf.mxu3 }
  0xa5   :  { %v63_v21 = vsel %vm59_vm0, %v56_v20, -inf }
  0xa8   :  { %64 = vmax.xlane.f32.xlu0 %v63_v21 }
 0x113   :  { %v62_v31 = vpop.xlane.xlu0 %61 }
 0x114   :  { %v66_v32 = vsub.f32 %v53_v18, %v62_v31  ;;  %vm110_vm1 = vcmp.eq.f32.partialorder %v53_v18, %v62_v31 }
 0x115   :  { %v112_v34 = vsel %vm110_vm1, %v418_v29, 4 }
 0x116   :  { %v68_v35 = vmul.f32 1.442695, %v66_v32  ;;  %v114_v36 = vsel %vm59_vm0, %v112_v34, 2147483647 }
 0x117   :  { %v116_v38 = vshra.s32 %v114_v36, 16  ;;  %v115_v59 = vand.u32 65535, %v114_v36  ;;  %v197_v36 = vpop.f32.mrf.mxu1 }
 0x118   :  { %276 = vpow2.f32 %v68_v35 }
 0x119   :  { %v118_v40 = vcvt.s32.f32 %v116_v38  ;;  %v117_v61 = vcvt.s32.f32 %v115_v59 }
 0x11b   :  { %119 = vmin.xlane.f32.xlu1 %v118_v40  ;;  %v65_v42 = vpop.xlane.xlu0 %64 }
 0x11c   :  { %v67_v43 = vsub.f32 %v56_v20, %v65_v42  ;;  %vm111_vm2 = vcmp.eq.f32.partialorder %v56_v20, %v65_v42 }
 0x11d   :  { %v113_v45 = vsel %vm111_vm2, %v418_v29, 4 }
 0x11e   :  { %v277_v46 = vpop.eup %276  ;;  %v70_v47 = vmul.f32 1.442695, %v67_v43  ;;  %v129_v48 = vsel %vm59_vm0, %v113_v45, 2147483647 }
 0x11f   :  { %v72_v50 = vsel %vm59_vm0, %v277_v46, 0.0  ;;  %v131_v51 = vshra.s32 %v129_v48, 16  ;;  %v130_v63 = vand.u32 65535, %v129_v48 }
 0x120   :  { %278 = vpow2.f32 %v70_v47  ;;  %73 = vadd.xlane.f32.xlu2 %v72_v50 }
 0x121   :  { %v133_v53 = vcvt.s32.f32 %v131_v51  ;;  %v132_v1 = vcvt.s32.f32 %v130_v63 }
 0x123   :  { %134 = vmin.xlane.f32.xlu1 %v133_v53 }
 0x126   :  { %v279_v54 = vpop.eup %278 }
 0x127   :  { %v75_v55 = vsel %vm59_vm0, %v279_v54, 0.0 }
 0x128   :  { %76 = vadd.xlane.f32.xlu2 %v75_v55 }
 0x18e   :  { %v120_v60 = vpop.xlane.xlu1 %119 }
 0x18f   :  { %vm121_vm3 = vcmp.eq.f32.partialorder %v118_v40, %v120_v60  ;;  %v126_v18 = vcvt.f32.s32 %v120_v60 }
 0x190   :  { %v122_v62 = vsel %vm121_vm3, %v117_v61, inf }
 0x191   :  { %123 = vmin.xlane.f32.xlu0 %v122_v62  ;;  %v127_v23 = vshll.u32 %v126_v18, 16 }
 0x193   :  { %v74_v6 = vpop.xlane.xlu2 %73 }
 0x194   :  { %280 = vrcp.f32 %v74_v6  ;;  %v89_v21 = vand.u32 2147483648, %v74_v6  ;;  %vm83_vm6 = vweird.f32 %v74_v6  ;;  %v87_v25 = vand.u32 2147483647, %v74_v6 }
 0x196   :  { %v135_v0 = vpop.xlane.xlu1 %134  ;;  %v90_v31 = vor.u32 1.1754944e-38, %v89_v21  ;;  %vm88_vm8 = vcmp.eq.f32.partialorder %v87_v25, 8.507059e+37 }
 0x197   :  { %vm136_vm4 = vcmp.eq.f32.partialorder %v133_v53, %v135_v0  ;;  %v141_v30 = vcvt.f32.s32 %v135_v0  ;;  %v200_v53 = vpop.f32.mrf.mxu1 }
 0x198   :  { %v137_v2 = vsel %vm136_vm4, %v132_v1, inf }
 0x199   :  { %138 = vmin.xlane.f32.xlu1 %v137_v2  ;;  %v142_v37 = vshll.u32 %v141_v30, 16 }
 0x19a   :  { %v281_v12 = vpop.eup %280 }
 0x19b   :  { %v77_v11 = vpop.xlane.xlu2 %76  ;;  %v79_v13 = vmul.f32 %v281_v12, %v74_v6  ;;  %vm84_vm5 = vweird.f32 %v281_v12 }
 0x19c   :  { %282 = vrcp.f32 %v77_v11  ;;  %vm85_vm7 = vmor %vm83_vm6, %vm84_vm5  ;;  %vm97_vm10 = vweird.f32 %v77_v11  ;;  %v101_v38 = vand.u32 2147483647, %v77_v11  ;;  %v103_v39 = vand.u32 2147483648, %v77_v11 }
 0x19d   :  { %v80_v14 = vsub.f32 1.0, %v79_v13 }
 0x19e   :  { %v104_v47 = vor.u32 1.1754944e-38, %v103_v39  ;;  %vm102_vm0 = vcmp.eq.f32.partialorder %v101_v38, 8.507059e+37 }
 0x19f   :  { %v81_v16 = vmul.f32 %v281_v12, %v80_v14 }
 0x1a1   :  { %v82_v20 = vadd.f32 %v281_v12, %v81_v16 }
 0x1a2   :  { %v283_v15 = vpop.eup %282 }
 0x1a3   :  { %v93_v17 = vmul.f32 %v283_v15, %v77_v11  ;;  %v86_v28 = vsel %vm85_vm7, %v281_v12, %v82_v20  ;;  %vm98_vm9 = vweird.f32 %v283_v15 }
 0x1a4   :  { %v91_v33 = vsel %vm88_vm8, %v90_v31, %v86_v28  ;;  %vm482_vm11 = vmor %vm97_vm10, %vm98_vm9 }
 0x1a5   :  { %v94_v19 = vsub.f32 1.0, %v93_v17  ;;  %v106_v43 = vmul.f32 0.5, %v91_v33 }
 0x1a7   :  { %v95_v26 = vmul.f32 %v283_v15, %v94_v19 }
 0x1a9   :  { %v96_v34 = vadd.f32 %v283_v15, %v95_v26 }
 0x1ab   :  { %v100_v46 = vsel %vm482_vm11, %v283_v15, %v96_v34 }
 0x1ac   :  { %v105_v50 = vsel %vm102_vm0, %v104_v47, %v100_v46 }
 0x1ad   :  { %v107_v52 = vmul.f32 0.5, %v105_v50 }
 0x204   :  { %v124_v22 = vpop.xlane.xlu0 %123 }
 0x205   :  { %v125_v24 = vcvt.f32.s32 %v124_v22 }
 0x207   :  { %v128_v27 = vadd.s32 %v127_v23, %v125_v24 }
 0x209   :  { %v144_v32 = vmul.u32 16, %v128_v27 }
 0x20b   :  { %v148_v35 = vadd.s32 16, %v144_v32  ;;  %vm146_vm12 = vcmp.ge.s32.totalorder %v418_v29, %v144_v32 }
 0x20c   :  { %v139_v40 = vpop.xlane.xlu1 %138 }
 0x20d   :  { %v140_v42 = vcvt.f32.s32 %v139_v40  ;;  %vm150_vm13 = vcmp.lt.s32.totalorder %v418_v29, %v148_v35 }
 0x20e   :  { %vm152_vm14 = vmand %vm146_vm12, %vm150_vm13 }
 0x20f   :  { %v143_v44 = vadd.s32 %v142_v37, %v140_v42  ;;  %v154_v45 = vsel %vm152_vm14, %v106_v43, 0.0 }
 0x210   :  { %v203_v48 = vmul.f32 %v197_v36, %v154_v45 }
 0x211   :  { %v145_v49 = vmul.u32 16, %v143_v44 }
 0x212   :  { %255 = vmatmul.msk.f32.vlgmr.msra.gmra.mxu2 %vm205_vm15, %v203_v48 }
 0x213   :  { %v149_v51 = vadd.s32 16, %v145_v49  ;;  %vm147_vm1 = vcmp.ge.s32.totalorder %v418_v29, %v145_v49 }
 0x215   :  { %vm151_vm2 = vcmp.lt.s32.totalorder %v418_v29, %v149_v51 }
 0x216   :  { %vm153_vm3 = vmand %vm147_vm1, %vm151_vm2 }
 0x217   :  { %v155_v54 = vsel %vm153_vm3, %v107_v52, 0.0 }
 0x218   :  { %v204_v55 = vmul.f32 %v200_v53, %v155_v54 }
 0x21a   :  { %256 = vmatmul.msk.f32.gmra.mxu2 %vm205_vm15, %v204_v55 }
 0x295   :  { %v229_v56 = vpop.f32.mrf.mxu2 }
 0x296   :  { %235 = vst [vmem:[#allocation2] sm:$0xff] %v229_v56 }
 0x29d   :  { %v232_v57 = vpop.f32.mrf.mxu2 }
 0x29e   :  { %236 = vst [vmem:[#allocation2 + $0x8] sm:$0xff] %v232_v57 }
 0x29f   :  { %249 = dma.vmem_to_hbm [thread:$0]  %s242_s16, 256, %s244_s19, [#allocation3], %s311_s20, %s311_s20, %s312_s21  }
 0x2a0   :  { %308 = dma.done.wait [#allocation3], 256  }
 0x2a1   :  { %309 = vsyncadd [#allocation3], 4294967040 }
 0x2a2   :  { %254 = vsyncpa [#allocation3], 1 }

</bundles_post_ra>
